<compile_context>
chip_gen: v7x
topology: tpu7x:2x2x1
jax: 0.10.0
libtpu: 0.0.40
codegen_flags: <defaults>
</compile_context>

<pallas_src>
import functools

import jax
import jax.numpy as jnp
from jax import lax
from jax.experimental import pallas as pl
from jax.experimental.pallas import tpu as pltpu

OUT_H = 32
OUT_W = 32


def _topo_preproc_kernel(x_ref, y_ref, q_ref, o_ref, z_ref, *, inv_area):
    """Per-batch fused kernel: channel softmax + one-hot(y) + drop channel 0
    + (H,W)->(32,32) average pooling via ONE MXU matmul.

    x_ref: (C, OUT_H, kh*W) f32 logits  (batch dim squeezed; (H, W) was
           reshaped to (OUT_H, kh*W) in the wrapper — free metadata reshape)
    y_ref: (OUT_H, kh*W)    i32 labels  (same reshape)
    q_ref: (kh*W, OUT_W)    bf16 0/1 pooling selector, Q[dh*W+w, ow] = (w//kw == ow)
    o_ref: (2*(C-1)*OUT_H, OUT_W) f32 pooled planes; row (m*OUT_H + oh) with
           m = pair*(C-1) + c:  pair 0 -> softmax channel c+1,
                                pair 1 -> one-hot channel c+1.
    z_ref: (2*(C-1)*OUT_H, kh*W) bf16 VMEM scratch (stacked matmul operand).
    """
    C, OH, KW = x_ref.shape
    CH = (C - 1) * OH                                       # rows per "pair"

    # ---- apply_nonlin: numerically-stable softmax over channels -----------
    # Exact f32 division (no approx reciprocal): downstream persistence
    # diagrams depend on value ordering and the divide is off-critical-path.
    x = x_ref[...]                                          # (C, OH, KW)
    x_max = jnp.max(x, axis=0, keepdims=True)
    e = jnp.exp(x - x_max)
    denom = jnp.sum(e, axis=0, keepdims=True)               # (1, OH, KW)
    probs_fg = e[1:] / denom                                # (C-1, OH, KW), bg dropped

    # Foreground softmax planes -> bf16 operand rows [0, CH). No concat copy.
    z_ref[pl.ds(0, CH), :] = probs_fg.reshape(CH, KW).astype(jnp.bfloat16)

    # ---- one-hot(y) for foreground channels: single broadcast compare -----
    lab = y_ref[...]                                        # (OH, KW) i32
    cls = lax.broadcasted_iota(jnp.int32, (C - 1, OH, KW), 0) + 1
    onehot = (lab[None, :, :] == cls).astype(jnp.float32)   # (C-1, OH, KW)
    z_ref[pl.ds(CH, CH), :] = onehot.reshape(CH, KW).astype(jnp.bfloat16)

    # ---- fused 2D average pool: ONE MXU matmul over K = kh*W --------------
    # Q is 0/1 (exact in bf16); the 1/(kh*kw) scale is applied to the f32
    # accumulator, so the one-hot path is exact for any kh, kw.
    pooled = jnp.dot(z_ref[...], q_ref[...],
                     preferred_element_type=jnp.float32)    # (2*(C-1)*OH, OUT_W)
    o_ref[...] = pooled * inv_area


def wasserstein_ph_loss_preprocess(x, y):
    """x: (B,C,H,W) f32 logits; y: (B,H,W) int labels.

    Returns (x_top_inp, y_top_np): the (B, C-1, 32, 32) tensors the PyTorch
    module feeds into CubicalComplex / WassersteinDistance.
    """
    B, C, H, W = x.shape
    assert C >= 2, "need at least one foreground channel"
    assert H % OUT_H == 0 and W % OUT_W == 0, \
        "adaptive_avg_pool2d reduces to a uniform average pool for divisible sizes"
    kh, kw = H // OUT_H, W // OUT_W
    KW = kh * W
    M = 2 * (C - 1)

    # Free, row-major metadata reshapes: (H, W) -> (OUT_H, kh*W).
    x_r = x.reshape(B, C, OUT_H, KW)
    y_r = y.astype(jnp.int32).reshape(B, OUT_H, KW)

    # 0/1 pooling selector; built once, kept resident in VMEM across grid
    # steps via a constant index_map (DMA'd a single time, never regenerated).
    col = jnp.arange(KW, dtype=jnp.int32) % W
    q = (col[:, None] // kw ==
         jnp.arange(OUT_W, dtype=jnp.int32)[None, :]).astype(jnp.bfloat16)

    kernel = functools.partial(_topo_preproc_kernel, inv_area=1.0 / (kh * kw))

    grid_spec = pltpu.PrefetchScalarGridSpec(
        num_scalar_prefetch=0,
        grid=(B,),
        in_specs=[
            # squeezed batch dim -> kernel sees (C, OUT_H, kh*W) / (OUT_H, kh*W)
            pl.BlockSpec((None, C, OUT_H, KW), lambda b: (b, 0, 0, 0)),
            pl.BlockSpec((None, OUT_H, KW), lambda b: (b, 0, 0)),
            pl.BlockSpec((KW, OUT_W), lambda b: (0, 0)),      # resident constant
        ],
        out_specs=pl.BlockSpec((None, M * OUT_H, OUT_W), lambda b: (b, 0, 0)),
        scratch_shapes=[pltpu.VMEM((M * OUT_H, KW), jnp.bfloat16)],
    )
    out = pl.pallas_call(
        kernel,
        out_shape=jax.ShapeDtypeStruct((B, M * OUT_H, OUT_W), jnp.float32),
        grid_spec=grid_spec,
        compiler_params=pltpu.CompilerParams(
            dimension_semantics=("parallel",)),
    )(x_r, y_r, q)

    # Free wrapper-side reshape back to (B, C-1, 32, 32); no transpose needed:
    #   out[b, (pair*(C-1)+c)*OUT_H + oh, ow] -> result[pair][b, c, oh, ow]
    out = out.reshape(B, 2, C - 1, OUT_H, OUT_W)
    x_top, y_top = out[:, 0], out[:, 1]

    # TODO(synk): cubical persistence + Wasserstein matching of the diagrams
    # (the final scalar reduction of the PyTorch module) is not expressible
    # as a Pallas kernel; downstream code would consume (x_top, y_top).
    return x_top, y_top


def _reference(x, y):
    """Pure-JAX reference of the same preprocessing (for validation)."""
    C = x.shape[1]
    probs = jax.nn.softmax(x, axis=1)
    yh = jax.nn.one_hot(y, C, axis=1, dtype=x.dtype)

    def pool(t):
        B, Cm, H, W = t.shape
        return t.reshape(B, Cm, OUT_H, H // OUT_H, OUT_W, W // OUT_W).mean(axis=(3, 5))

    return pool(probs[:, 1:]), pool(yh[:, 1:])


if __name__ == "__main__":
    B, C, H, W = 2, 4, 64, 64
    key = jax.random.PRNGKey(0)
    kx, ky = jax.random.split(key)
    x = jax.random.normal(kx, (B, C, H, W), dtype=jnp.float32)
    y = jax.random.randint(ky, (B, H, W), 0, C, dtype=jnp.int32)

    x_top, y_top = wasserstein_ph_loss_preprocess(x, y)
    x_top = jax.block_until_ready(x_top)
    y_top = jax.block_until_ready(y_top)

    x_want, y_want = _reference(x, y)
    assert x_top.shape == (B, C - 1, OUT_H, OUT_W)
    assert y_top.shape == (B, C - 1, OUT_H, OUT_W)
    # Tolerance covers bf16 quantization of the softmax planes on the MXU
    # (<2e-3 relative); the one-hot path is exact (0/1 operands, f32 accum,
    # power-of-two scaling applied in f32).
    assert jnp.allclose(x_top, x_want, atol=2e-3, rtol=2e-3)
    assert jnp.allclose(y_top, y_want, atol=2e-3, rtol=2e-3)

    print("KERNEL_OK")
</pallas_src>

<mosaic_0001>
module attributes {stable_mosaic.version = 11 : i64} {
  func.func @_topo_preproc_kernel(%arg0: i32, %arg1: memref<1x4x32x128xf32, #tpu.memory_space<vmem>>, %arg2: memref<1x32x128xi32, #tpu.memory_space<vmem>>, %arg3: memref<128x32xbf16, #tpu.memory_space<vmem>>, %arg4: memref<1x192x32xf32, #tpu.memory_space<vmem>>, %arg5: memref<192x128xbf16, #tpu.memory_space<vmem>>) attributes {dimension_semantics = [#tpu.dimension_semantics<parallel>], iteration_bounds = array<i64: 2>, scalar_prefetch = 0 : i64, scratch_operands = 1 : i64, tpu.core_type = #tpu.core_type<tc>, window_params = [{transform_indices = @transform_0, window_bounds = array<i64: 1, 4, 32, 128>}, {transform_indices = @transform_1, window_bounds = array<i64: 1, 32, 128>}, {pipeline_mode = #tpu.pipeline_mode<synchronous>, transform_indices = @transform_2, window_bounds = array<i64: 128, 32>}, {transform_indices = @transform_3, window_bounds = array<i64: 1, 192, 32>}]} {
    %c0 = arith.constant 0 : index
    %c0_0 = arith.constant 0 : index
    %c0_1 = arith.constant 0 : index
    %c0_2 = arith.constant 0 : index
    %0 = vector.load %arg1[%c0, %c0_0, %c0_1, %c0_2] : memref<1x4x32x128xf32, #tpu.memory_space<vmem>>, vector<1x4x32x128xf32>
    %1 = vector.shape_cast %0 : vector<1x4x32x128xf32> to vector<4x32x128xf32>
    %cst = arith.constant dense<0xFF800000> : vector<32x128xf32>
    %2 = vector.multi_reduction <maximumf>, %1, %cst [0] : vector<4x32x128xf32> to vector<32x128xf32>
    %3 = vector.shape_cast %2 : vector<32x128xf32> to vector<1x32x128xf32>
    %4 = vector.broadcast %3 : vector<1x32x128xf32> to vector<4x32x128xf32>
    %5 = arith.subf %1, %4 : vector<4x32x128xf32>
    %6 = math.exp %5 : vector<4x32x128xf32>
    %cst_3 = arith.constant dense<0.000000e+00> : vector<32x128xf32>
    %7 = vector.multi_reduction <add>, %6, %cst_3 [0] : vector<4x32x128xf32> to vector<32x128xf32>
    %8 = vector.shape_cast %7 : vector<32x128xf32> to vector<1x32x128xf32>
    %9 = vector.extract_strided_slice %6 {offsets = [1, 0, 0], sizes = [3, 32, 128], strides = [1, 1, 1]} : vector<4x32x128xf32> to vector<3x32x128xf32>
    %10 = vector.broadcast %8 : vector<1x32x128xf32> to vector<3x32x128xf32>
    %11 = arith.divf %9, %10 : vector<3x32x128xf32>
    %12 = vector.shape_cast %11 : vector<3x32x128xf32> to vector<96x128xf32>
    %13 = arith.truncf %12 : vector<96x128xf32> to vector<96x128xbf16>
    %c0_4 = arith.constant 0 : index
    %c0_5 = arith.constant 0 : index
    %14 = vector.load %arg5[%c0_4, %c0_5] : memref<192x128xbf16, #tpu.memory_space<vmem>>, vector<96x128xbf16>
    tpu.vector_store %arg5[%c0_4, %c0_5], %13 {strides = array<i32>} : memref<192x128xbf16, #tpu.memory_space<vmem>>, vector<96x128xbf16>,
    %c0_6 = arith.constant 0 : index
    %c0_7 = arith.constant 0 : index
    %c0_8 = arith.constant 0 : index
    %15 = vector.load %arg2[%c0_6, %c0_7, %c0_8] : memref<1x32x128xi32, #tpu.memory_space<vmem>>, vector<1x32x128xi32>
    %16 = vector.shape_cast %15 : vector<1x32x128xi32> to vector<32x128xi32>
    %17 = tpu.iota {dimensions = array<i32: 0>} : vector<3x32x128xi32>
    %c1_i32 = arith.constant 1 : i32
    %18 = vector.broadcast %c1_i32 : i32 to vector<3x32x128xi32>
    %19 = arith.addi %17, %18 : vector<3x32x128xi32>
    %20 = vector.shape_cast %16 : vector<32x128xi32> to vector<1x32x128xi32>
    %21 = vector.broadcast %20 : vector<1x32x128xi32> to vector<3x32x128xi32>
    %22 = arith.cmpi eq, %21, %19 : vector<3x32x128xi32>
    %23 = arith.extui %22 : vector<3x32x128xi1> to vector<3x32x128xi32>
    %24 = arith.sitofp %23 : vector<3x32x128xi32> to vector<3x32x128xf32>
    %25 = vector.shape_cast %24 : vector<3x32x128xf32> to vector<96x128xf32>
    %26 = arith.truncf %25 : vector<96x128xf32> to vector<96x128xbf16>
    %c96 = arith.constant 96 : index
    %c0_9 = arith.constant 0 : index
    %27 = vector.load %arg5[%c96, %c0_9] : memref<192x128xbf16, #tpu.memory_space<vmem>>, vector<96x128xbf16>
    tpu.vector_store %arg5[%c96, %c0_9], %26 {strides = array<i32>} : memref<192x128xbf16, #tpu.memory_space<vmem>>, vector<96x128xbf16>,
    %c0_10 = arith.constant 0 : index
    %c0_11 = arith.constant 0 : index
    %28 = vector.load %arg5[%c0_10, %c0_11] : memref<192x128xbf16, #tpu.memory_space<vmem>>, vector<192x128xbf16>
    %c0_12 = arith.constant 0 : index
    %c0_13 = arith.constant 0 : index
    %29 = vector.load %arg3[%c0_12, %c0_13] : memref<128x32xbf16, #tpu.memory_space<vmem>>, vector<128x32xbf16>
    %cst_14 = arith.constant dense<0.000000e+00> : vector<192x32xf32>
    %30 = tpu.matmul %28, %29, %cst_14 {dimension_numbers = #tpu.dot_dimension_numbers<[1], [0], [0], [1], [0, 0, 1, 1], [], []>} : vector<192x128xbf16>, vector<128x32xbf16>, vector<192x32xf32> -> vector<192x32xf32>
    %cst_15 = arith.constant 2.500000e-01 : f32
    %31 = vector.broadcast %cst_15 : f32 to vector<192x32xf32>
    %32 = arith.mulf %30, %31 : vector<192x32xf32>
    %c0_16 = arith.constant 0 : index
    %c0_17 = arith.constant 0 : index
    %c0_18 = arith.constant 0 : index
    %33 = vector.load %arg4[%c0_16, %c0_17, %c0_18] : memref<1x192x32xf32, #tpu.memory_space<vmem>>, vector<1x192x32xf32>
    %34 = vector.shape_cast %33 : vector<1x192x32xf32> to vector<192x32xf32>
    %35 = vector.shape_cast %32 : vector<192x32xf32> to vector<1x192x32xf32>
    tpu.vector_store %arg4[%c0_16, %c0_17, %c0_18], %35 {strides = array<i32>} : memref<1x192x32xf32, #tpu.memory_space<vmem>>, vector<1x192x32xf32>,
    return
  }
  func.func @transform_0(%arg0: i32) -> (i32, i32, i32, i32) {
    %c0_i32 = arith.constant 0 : i32
    %c0_i32_0 = arith.constant 0 : i32
    %c0_i32_1 = arith.constant 0 : i32
    %c0_i32_2 = arith.constant 0 : i32
    return %arg0, %c0_i32, %c0_i32_0, %c0_i32_1 : i32, i32, i32, i32
  }
  func.func @transform_1(%arg0: i32) -> (i32, i32, i32) {
    %c0_i32 = arith.constant 0 : i32
    %c0_i32_0 = arith.constant 0 : i32
    %c0_i32_1 = arith.constant 0 : i32
    return %arg0, %c0_i32, %c0_i32_0 : i32, i32, i32
  }
  func.func @transform_2(%arg0: i32) -> (i32, i32) {
    %c0_i32 = arith.constant 0 : i32
    %c0_i32_0 = arith.constant 0 : i32
    %c0_i32_1 = arith.constant 0 : i32
    return %c0_i32, %c0_i32_0 : i32, i32
  }
  func.func @transform_3(%arg0: i32) -> (i32, i32, i32) {
    %c0_i32 = arith.constant 0 : i32
    %c0_i32_0 = arith.constant 0 : i32
    %c0_i32_1 = arith.constant 0 : i32
    return %arg0, %c0_i32, %c0_i32_0 : i32, i32, i32
  }
}

</mosaic_0001>

<bundles_post_ra>
// kernel: tpu_custom_call.1
= control target key start
LH: loop header
LB: loop body
LE: loop exit
PB: predicated region body
PF: predicated region fallthrough
CT: control target
= control target key end

     0   :  { %8 = vsyncpa [#allocation4], 0  ;;  %s1292_s0 = inlined_call_operand.hbm [shape: f32[2,4,32,128], index: 0, kind: input, shape index: {}]   ;;  %s1293_s1 = inlined_call_operand.vmem [shape: s32[2,32,128], index: 1, kind: input, shape index: {}]   ;;  %s1294_s2 = inlined_call_operand.vmem [shape: bf16[128,32], index: 2, kind: input, shape index: {}]   ;;  %s1295_s3 = inlined_call_operand.vmem [shape: f32[2,192,32], index: 3, kind: output, shape index: {}]  }
   0x1   :  { %10 = vsyncpa [#allocation4 + $0x1], 0  ;;  %s1017_s12 = smov 0   ;;  %s1019_s13 = smov 0  }
   0x2   :  { %s1021_s14 = smov 0   ;;  %s1023_s15 = smov 0  }
   0x3 LB: > { %s1036_s16 = sadd.s32 4294967295, %s991_s15   ;;  %s1039_s17 = sadd.s32 1, %s991_s15   ;;  %s991_s15 = sphi %s1023_s15, %s1304_s15   ;;  %s987_s14 = sphi %s1021_s14, %s1303_s14   ;;  %s983_s13 = sphi %s1019_s13, %s1302_s13   ;;  %s979_s12 = sphi %s1017_s12, %s1301_s12  }
   0x4   : > { %s20_s18 = ssub.s32 %s991_s15, %s1039_s17  ;;  %s23_s19 = sadd.s32 1, %s987_s14 }
   0x5   : > { %p21_p0 = scmp.eq.s32.totalorder %s20_s18, 0  ;;  %p30_p1 = scmp.ne.s32.totalorder %s987_s14, %s983_s13 }
   0x6   : > { %p31_p2 = scmp.eq.s32.totalorder %s991_s15, 0  ;;  %p36_p3 = scmp.ne.s32.totalorder %s983_s13, %s979_s12 }
   0x7   : > { %s1049_s20 = scalar_select %p21_p0, %s987_s14, %s23_s19  }
   0x8   : > { %p32_p4 = por %p31_p2, %p30_p1  ;;  %p37_p5 = scmp.eq.s32.totalorder %s1036_s16, 0 }
   0x9   : > { %p843_p6 = scmp.lt.s32.totalorder %s991_s15, 2  ;;  %s136_s22 = sand.u32 1, %s987_s14  }
   0xa   : > { %p1053_p7 = por %p37_p5, %p36_p3  ;;  %s716_s23 = sshll.u32 %s136_s22, 7 }
   0xb   : > { %s746_s24 = sshll.u32 %s991_s15, 11  ;;  %s140_s28 = scalar_lea.vmem [#allocation3], %s716_s23 }
   0xc   : > { %s1062_s27 = scalar_lea.hbm %s1292_s0, %s746_s24  ;;  %s147_s29 = sshll.u32 %s140_s28, 4  ;;  %s1064_s29 = int_to_ptr.vmem [resolvable:$true] %s147_s29 }
   0xd   : > { %p1066_p8 = pnand %p843_p6, %p32_p4  ;;  %s1071_s4 = scalar_lea.sflag [#allocation4], %s136_s22 }
   0xe   : > { %s927_s5 = scalar_lea.hbm %s1062_s27, 2048  ;;  %s932_s8 = scalar_lea.hbm %s1292_s0, 4096 }
   0xf   : > { %p928_p10 = scmp.ne.s32.totalorder %s1062_s27, %s927_s5  ;;  %p929_p11 = pneg %p1066_p8 }
  0x10   : > { %p933_p0 = scmp.lt.u32.totalorder %s1062_s27, %s1292_s0  ;;  %p934_p1 = scmp.lt.u32.totalorder %s932_s8, %s927_s5 }
  0x11   : > { %p930_p12 = pnand %p929_p11, %p928_p10  ;;  %p936_p3 = scmp.lt.u32.totalorder %s927_s5, %s1062_s27 }
  0x12   : > { %p935_p2 = por %p934_p1, %p933_p0 }
  0x13   : > { %p931_p13 = pneg %p930_p12 }
  0x14   : > { %p937_p4 = por %p936_p3, %p935_p2 }
  0x16   : > { %p938_p5 = pnand %p937_p4, %p931_p13 }
  0x18   : > { %941 = shalt.err (!%p938_p5)
}
  0x19   : > { %s942_s11 = scalar_lea.vmem %s1064_s29, 2048  ;;  %s993_s12 = smov [#allocation3]  }
  0x1a   : > { %p943_p6 = scmp.ne.s32.totalorder %s1064_s29, %s942_s11  ;;  %s947_s18 = sshll.u32 %s993_s12, 4  ;;  %s948_s18 = int_to_ptr.vmem [resolvable:$false] %s947_s18 }
  0x1b   : > { %s949_s19 = scalar_lea.vmem %s948_s18, 4096  ;;  %p950_p9 = scmp.lt.s32.totalorder %s1064_s29, %s948_s18 }
  0x1c   : > { %p945_p10 = pnand %p943_p6, %p929_p11  ;;  %p951_p0 = scmp.lt.s32.totalorder %s949_s19, %s942_s11 }
  0x1e   : > { %p946_p12 = pneg %p945_p10  ;;  %p952_p1 = por %p951_p0, %p950_p9 }
  0x20   : > { %p953_p2 = pnand %p952_p1, %p946_p12 }
  0x22   : > { %956 = shalt.err (!%p953_p2)
}
  0x23   : > { %s994_s22 = smov 128   ;;  %s995_s23 = smov 8  }
  0x24   : > { %842 = dma.hbm_to_vmem [thread:$0]  (!%p1066_p8), %s1062_s27, 2048, %s1064_s29, %s1071_s4, %s994_s22, %s994_s22, %s995_s23  }
  0x25   : > { %p163_p11 = scmp.lt.s32.totalorder %s991_s15, 3  ;;  %p1298_p13 = scmp.ge.s32.totalorder %s991_s15, 1 }
  0x27   : > { %p164_p3 = pnand %p1298_p13, %p163_p11 }
  0x28   : > { %s169_s24 = sand.u32 (!%p164_p3), 1, %s983_s13  }
  0x29   : > { %167 = sbr.rel (%p164_p3) target bundleno = 339 (0x153), region = 32  ;;  %s720_s25 = sshll.u32 (!%p164_p3), %s169_s24, 7 }
  0x2a   : > { %s170_s26 = scalar_lea.sflag (!%p164_p3), [#allocation4], %s169_s24  ;;  %s1103_s28 = scalar_lea.vmem (!%p164_p3), [#allocation3], %s720_s25 }
  0x30   : > { %974 = dma.done.wait (%p1053_p7), %s170_s26, 2048  }
  0x31   : > { %976 = vsyncadd (%p1053_p7), %s170_s26, 4294965248  ;;  %p201_p9 = scmp.lt.s32.totalorder %s1036_s16, 1  ;;  %v879_v0 = vld [vmem:[%s1294_s2] sm:$0xff]   ;;  %v880_v1 = vld [vmem:[%s1294_s2 + $0x8] sm:$0xff]   ;;  %v996_v19 = vmov 1.0|1.0  }
  0x32   : > { %820 = vmatprep.subr.bf16.mxu1 %v879_v0  ;;  %780 = vmatprep.subr.bf16.mxu0 %v879_v0  ;;  %v881_v2 = vld [vmem:[%s1294_s2 + $0x10] sm:$0xff]   ;;  %v882_v3 = vld [vmem:[%s1294_s2 + $0x18] sm:$0xff]   ;;  %v212_v6 = vld [vmem:[%s1103_s28] sm:$0xff] }
  0x33   : > { %s1306_s16 = smov (!%p201_p9, %s1036_s16), 1  ;;  %828 = vmatpush3.bf16.msra.mxu1 %v879_v0  ;;  %781 = vmatpush3.bf16.msra.mxu0 %v879_v0  ;;  %v213_v7 = vld [vmem:[%s1103_s28 + $0x8] sm:$0xff]  ;;  %v216_v9 = vld [vmem:[%s1103_s28 + $0x20] sm:$0xff]  ;;  %v1155_v18 = vld [vmem:[%s1103_s28 + $0x10] sm:$0xff] }
  0x34   : > { %s747_s4 = sshll.u32 %s1306_s16, 5  ;;  %821 = vmatprep.subr.bf16.mxu1 %v880_v1  ;;  %782 = vmatprep.subr.bf16.mxu0 %v880_v1  ;;  %v217_v10 = vld [vmem:[%s1103_s28 + $0x28] sm:$0xff]  ;;  %v883_v11 = vld [vmem:[%s1294_s2 + $0x20] sm:$0xff]   ;;  %v228_v14 = vmax.f32 %v212_v6, %v216_v9  ;;  %v215_v22 = vld [vmem:[%s1103_s28 + $0x18] sm:$0xff]  ;;  %s836_s26 = smul.u32 192, %s1306_s16 }
  0x35   : > { %s1126_s8 = scalar_lea.vmem %s1293_s1, %s747_s4  ;;  %v220_v12 = vld [vmem:[%s1103_s28 + $0x40] sm:$0xff]  ;;  %v221_v13 = vld [vmem:[%s1103_s28 + $0x48] sm:$0xff]  ;;  %v231_v15 = vmax.f32 %v213_v7, %v217_v10  ;;  %v1162_v23 = vld [vmem:[%s1103_s28 + $0x30] sm:$0xff] }
  0x36   : > { %v1132_v4 = vld [vmem:[%s1126_s8] sm:$0xff]  ;;  %v1135_v5 = vld [vmem:[%s1126_s8 + $0x8] sm:$0xff]  ;;  %v229_v20 = vmax.f32 %v228_v14, %v220_v12  ;;  %v1165_v24 = vld [vmem:[%s1103_s28 + $0x38] sm:$0xff]  ;;  %v234_v27 = vmax.f32 %v1155_v18, %v1162_v23  ;;  %s1229_s27 = scalar_lea.vmem %s1295_s3, %s836_s26 }
  0x37   : > { %829 = vmatpush3.bf16.msra.mxu1 %v880_v1  ;;  %783 = vmatpush3.bf16.msra.mxu0 %v880_v1  ;;  %vm332_vm0 = vcmp.eq.s32.totalorder %v1132_v4, 1  ;;  %vm333_vm1 = vcmp.eq.s32.totalorder %v1135_v5, 1  ;;  %v224_v16 = vld [vmem:[%s1103_s28 + $0x60] sm:$0xff]  ;;  %v225_v17 = vld [vmem:[%s1103_s28 + $0x68] sm:$0xff]  ;;  %v232_v21 = vmax.f32 %v231_v15, %v221_v13  ;;  %v1168_v25 = vld [vmem:[%s1103_s28 + $0x50] sm:$0xff]  ;;  %v237_v28 = vmax.f32 %v215_v22, %v1165_v24 }
  0x38   : > { %822 = vmatprep.subr.bf16.mxu1 %v881_v2  ;;  %784 = vmatprep.subr.bf16.mxu0 %v881_v2  ;;  %vm1141_vm2 = vmpackc.low %vm333_vm1, %vm332_vm0  ;;  %v1171_v26 = vld [vmem:[%s1103_s28 + $0x58] sm:$0xff]  ;;  %v230_v29 = vmax.f32 %v229_v20, %v224_v16  ;;  %v884_v31 = vld [vmem:[%s1294_s2 + $0x28] sm:$0xff]   ;;  %v235_v33 = vmax.f32 %v234_v27, %v1168_v25  ;;  %vm336_vm5 = vcmp.eq.s32.totalorder %v1132_v4, 2  ;;  %vm337_vm6 = vcmp.eq.s32.totalorder %v1135_v5, 2 }
  0x39   : > { %808 = vmatprep.mubr.msk.bf16.mxu1 %vm1141_vm2, %v996_v19  ;;  %v233_v30 = vmax.f32 %v232_v21, %v225_v17  ;;  %v1180_v32 = vld [vmem:[%s1103_s28 + $0x70] sm:$0xff]  ;;  %v238_v34 = vmax.f32 %v237_v28, %v1171_v26  ;;  %v1185_v39 = vld [vmem:[%s1103_s28 + $0x78] sm:$0xff]  ;;  %vm752_vm8 = vmpackc.low %vm337_vm6, %vm336_vm5  ;;  %vm340_vm11 = vcmp.eq.s32.totalorder %v1132_v4, 3  ;;  %vm341_vm12 = vcmp.eq.s32.totalorder %v1135_v5, 3 }
  0x3a   : > { %v240_v35 = vsub.f32 %v212_v6, %v230_v29  ;;  %v244_v37 = vsub.f32 %v216_v9, %v230_v29  ;;  %v248_v40 = vsub.f32 %v220_v12, %v230_v29  ;;  %v252_v42 = vsub.f32 %v224_v16, %v230_v29  ;;  %v885_v47 = vld [vmem:[%s1294_s2 + $0x30] sm:$0xff]   ;;  %v886_v57 = vld [vmem:[%s1294_s2 + $0x38] sm:$0xff]   ;;  %vm756_vm14 = vmpackc.low %vm341_vm12, %vm340_vm11 }
  0x3b   : > { %830 = vmatpush3.bf16.msra.mxu1 %v881_v2  ;;  %785 = vmatpush3.bf16.msra.mxu0 %v881_v2  ;;  %v241_v36 = vsub.f32 %v213_v7, %v233_v30  ;;  %v245_v38 = vsub.f32 %v217_v10, %v233_v30  ;;  %v249_v41 = vsub.f32 %v221_v13, %v233_v30  ;;  %v1198_v58 = vld [vmem:[%s1126_s8 + $0x10] sm:$0xff]  ;;  %v1202_v61 = vld [vmem:[%s1126_s8 + $0x18] sm:$0xff]  ;;  %vm609_vm2 = vcmask 261120  }
  0x3c   : > { %823 = vmatprep.subr.bf16.mxu1 %v882_v3  ;;  %786 = vmatprep.subr.bf16.mxu0 %v882_v3  ;;  %v256_v43 = vmul.f32 1.442695, %v240_v35  ;;  %v264_v45 = vmul.f32 1.442695, %v244_v37  ;;  %v236_v46 = vmax.f32 %v235_v33, %v1180_v32  ;;  %v253_v48 = vsub.f32 %v225_v17, %v233_v30 }
  0x3d   : > { %v258_v44 = vmul.f32 1.442695, %v241_v36  ;;  %v266_v49 = vmul.f32 1.442695, %v245_v38  ;;  %v239_v50 = vmax.f32 %v238_v34, %v1185_v39  ;;  %v272_v51 = vmul.f32 1.442695, %v248_v40 }
  0x3e   : > { %887 = vpow2.f32 %v256_v43  ;;  %v242_v52 = vsub.f32 %v1155_v18, %v236_v46  ;;  %v274_v53 = vmul.f32 1.442695, %v249_v41  ;;  %v280_v55 = vmul.f32 1.442695, %v252_v42 }
  0x3f   : > { %831 = vmatpush3.bf16.msra.mxu1 %v882_v3  ;;  %787 = vmatpush3.bf16.msra.mxu0 %v882_v3  ;;  %889 = vpow2.f32 %v258_v44  ;;  %v243_v54 = vsub.f32 %v215_v22, %v239_v50  ;;  %v246_v56 = vsub.f32 %v1162_v23, %v236_v46  ;;  %v282_v59 = vmul.f32 1.442695, %v253_v48 }
  0x40   : > { %824 = vmatprep.subr.bf16.mxu1 %v883_v11  ;;  %788 = vmatprep.subr.bf16.mxu0 %v883_v11  ;;  %891 = vpow2.f32 %v264_v45  ;;  %v247_v60 = vsub.f32 %v1165_v24, %v239_v50  ;;  %v250_v62 = vsub.f32 %v1168_v25, %v236_v46  ;;  %v260_v63 = vmul.f32 1.442695, %v242_v52 }
  0x41   : > { %893 = vpow2.f32 %v266_v49  ;;  %v251_v0 = vsub.f32 %v1171_v26, %v239_v50  ;;  %v262_v1 = vmul.f32 1.442695, %v243_v54  ;;  %vm334_vm3 = vcmp.eq.s32.totalorder %v1198_v58, 1 }
  0x42   : > { %895 = vpow2.f32 %v272_v51  ;;  %v254_v2 = vsub.f32 %v1180_v32, %v236_v46  ;;  %v268_v3 = vmul.f32 1.442695, %v246_v56  ;;  %vm335_vm4 = vcmp.eq.s32.totalorder %v1202_v61, 1 }
  0x43   : > { %832 = vmatpush3.bf16.msra.mxu1 %v883_v11  ;;  %789 = vmatpush3.bf16.msra.mxu0 %v883_v11  ;;  %897 = vpow2.f32 %v274_v53  ;;  %v255_v6 = vsub.f32 %v1185_v39, %v239_v50  ;;  %v270_v7 = vmul.f32 1.442695, %v247_v60  ;;  %v276_v8 = vmul.f32 1.442695, %v250_v62  ;;  %vm750_vm7 = vmpackc.low %vm335_vm4, %vm334_vm3 }
  0x44   : > { %825 = vmatprep.subr.bf16.mxu1 %v884_v31  ;;  %790 = vmatprep.subr.bf16.mxu0 %v884_v31  ;;  %899 = vpow2.f32 %v280_v55  ;;  %v278_v9 = vmul.f32 1.442695, %v251_v0  ;;  %v284_v11 = vmul.f32 1.442695, %v254_v2  ;;  %vm338_vm9 = vcmp.eq.s32.totalorder %v1198_v58, 2 }
  0x45   : > { %901 = vpow2.f32 %v282_v59  ;;  %v286_v13 = vmul.f32 1.442695, %v255_v6  ;;  %vm339_vm10 = vcmp.eq.s32.totalorder %v1202_v61, 2  ;;  %vm342_vm15 = vcmp.eq.s32.totalorder %v1198_v58, 3 }
  0x46   : > { %903 = vpow2.f32 %v260_v63  ;;  %vm754_vm13 = vmpackc.low %vm339_vm10, %vm338_vm9  ;;  %vm343_vm0 = vcmp.eq.s32.totalorder %v1202_v61, 3 }
  0x47   : > { %833 = vmatpush3.bf16.msra.mxu1 %v884_v31  ;;  %791 = vmatpush3.bf16.msra.mxu0 %v884_v31  ;;  %905 = vpow2.f32 %v262_v1  ;;  %vm758_vm1 = vmpackc.low %vm343_vm0, %vm342_vm15 }
  0x48   : > { %826 = vmatprep.subr.bf16.mxu1 %v885_v47  ;;  %792 = vmatprep.subr.bf16.mxu0 %v885_v47  ;;  %v888_v10 = vpop.eup %887  ;;  %907 = vpow2.f32 %v268_v3 }
  0x49   : > { %v890_v12 = vpop.eup %889  ;;  %909 = vpow2.f32 %v270_v7 }
  0x4a   : > { %v892_v14 = vpop.eup %891  ;;  %911 = vpow2.f32 %v276_v8 }
  0x4b   : > { %834 = vmatpush3.bf16.msra.mxu1 %v885_v47  ;;  %793 = vmatpush3.bf16.msra.mxu0 %v885_v47  ;;  %v894_v15 = vpop.eup %893  ;;  %v288_v16 = vadd.f32 %v892_v14, %v888_v10  ;;  %913 = vpow2.f32 %v278_v9 }
  0x4c   : > { %827 = vmatprep.subr.bf16.mxu1 %v886_v57  ;;  %794 = vmatprep.subr.bf16.mxu0 %v886_v57  ;;  %v896_v17 = vpop.eup %895  ;;  %v291_v18 = vadd.f32 %v894_v15, %v890_v12  ;;  %915 = vpow2.f32 %v284_v11 }
  0x4d   : > { %v898_v20 = vpop.eup %897  ;;  %v289_v21 = vadd.f32 %v896_v17, %v288_v16  ;;  %917 = vpow2.f32 %v286_v13 }
  0x4e   : > { %v900_v22 = vpop.eup %899  ;;  %v292_v23 = vadd.f32 %v898_v20, %v291_v18 }
  0x4f   : > { %835 = vmatpush3.bf16.msra.mxu1 %v886_v57  ;;  %795 = vmatpush3.bf16.msra.mxu0 %v886_v57  ;;  %v902_v24 = vpop.eup %901  ;;  %v290_v25 = vadd.f32 %v900_v22, %v289_v21 }
  0x50   : > { %v904_v26 = vpop.eup %903  ;;  %v293_v27 = vadd.f32 %v902_v24, %v292_v23 }
  0x51   : > { %v906_v28 = vpop.eup %905  ;;  %919 = vrcp.f32 %v290_v25 }
  0x52   : > { %809 = vmatmul.mubr.msk.bf16.vlgmr.msra.gmra.mrb[0].mxu1 %vm750_vm7, %v996_v19  ;;  %v908_v29 = vpop.eup %907  ;;  %921 = vrcp.f32 %v293_v27 }
  0x53   : > { %812 = vmatprep.mubr.msk.bf16.mxu1 %vm752_vm8, %v996_v19  ;;  %v910_v30 = vpop.eup %909  ;;  %v294_v31 = vadd.f32 %v908_v29, %v904_v26 }
  0x54   : > { %v912_v32 = vpop.eup %911  ;;  %v297_v33 = vadd.f32 %v910_v30, %v906_v28 }
  0x55   : > { %v914_v4 = vpop.eup %913  ;;  %v295_v5 = vadd.f32 %v912_v32, %v294_v31 }
  0x56   : > { %v916_v34 = vpop.eup %915  ;;  %v298_v35 = vadd.f32 %v914_v4, %v297_v33 }
  0x57   : > { %v918_v36 = vpop.eup %917  ;;  %v296_v37 = vadd.f32 %v916_v34, %v295_v5 }
  0x58   : > { %v299_v38 = vadd.f32 %v918_v36, %v298_v35 }
  0x59   : > { %923 = vrcp.f32 %v296_v37 }
  0x5a   : > { %813 = vmatmul.mubr.msk.bf16.gmra.mrb[4].mxu1 %vm754_vm13, %v996_v19  ;;  %925 = vrcp.f32 %v299_v38 }
  0x5b   : > { %816 = vmatprep.mubr.msk.bf16.mxu1 %vm756_vm14, %v996_v19  ;;  %v920_v39 = vpop.eup %919 }
  0x5c   : > { %v922_v40 = vpop.eup %921  ;;  %v301_v41 = vmul.f32 %v920_v39, %v892_v14  ;;  %v308_v44 = vmul.f32 %v920_v39, %v896_v17  ;;  %v312_v54 = vmul.f32 %v920_v39, %v900_v22 }
  0x5d   : > { %v303_v42 = vmul.f32 %v922_v40, %v894_v15  ;;  %v309_v45 = vmul.f32 %v922_v40, %v898_v20 }
  0x5f   : > { %v316_v43 = vpack.c.bf16 %v303_v42, %v301_v41  ;;  %v318_v50 = vpack.c.bf16 %v309_v45, %v308_v44 }
  0x61   : > { %796 = vmatprep.mubr.bf16.mxu0 %v316_v43 }
  0x62   : > { %817 = vmatmul.mubr.msk.bf16.gmra.mrb[8].mxu1 %vm758_vm1, %v996_v19  ;;  %v313_v19 = vmul.f32 %v922_v40, %v902_v24 }
  0x63   : > { %v924_v46 = vpop.eup %923 }
  0x64   : > { %v926_v47 = vpop.eup %925  ;;  %v305_v48 = vmul.f32 %v924_v46, %v908_v29  ;;  %v310_v52 = vmul.f32 %v924_v46, %v912_v32  ;;  %v320_v56 = vpack.c.bf16 %v313_v19, %v312_v54  ;;  %v314_v57 = vmul.f32 %v924_v46, %v916_v34 }
  0x65   : > { %v307_v49 = vmul.f32 %v926_v47, %v910_v30  ;;  %v311_v53 = vmul.f32 %v926_v47, %v914_v4  ;;  %v315_v58 = vmul.f32 %v926_v47, %v918_v36 }
  0x67   : > { %v317_v51 = vpack.c.bf16 %v307_v49, %v305_v48  ;;  %v319_v55 = vpack.c.bf16 %v311_v53, %v310_v52  ;;  %v321_v59 = vpack.c.bf16 %v315_v58, %v314_v57 }
  0x69   : > { %797 = vmatmul.mubr.bf16.vlgmr.msra.gmra.mrb[0].mxu0 %v317_v51 }
  0x6a   : > { %800 = vmatprep.mubr.bf16.mxu0 %v318_v50 }
  0x71   : > { %801 = vmatmul.mubr.bf16.gmra.mrb[4].mxu0 %v319_v55 }
  0x72   : > { %804 = vmatprep.mubr.bf16.mxu0 %v320_v56 }
  0x79   : > { %805 = vmatmul.mubr.bf16.gmra.mrb[8].mxu0 %v321_v59 }
 0x125   : > { %v810_v60 = vpop.f32.mrb[0].mxu1 }
 0x126   : > { %v599_v61 = vmul.f32 0.25, %v810_v60  ;;  %v538_v62 = vpop.f32.mrb[1].mxu1 }
 0x127   : > { %v597_v63 = vmul.f32 0.25, %v538_v62  ;;  %v811_v0 = vpop.f32.mrb[2].mxu1 }
 0x128   : > { %624 = vst.msk [vmem:[%s1229_s27 + $0x70] sm:$0xff] %vm609_vm2, %v599_v61  ;;  %v600_v1 = vmul.f32 0.25, %v811_v0  ;;  %v541_v2 = vpop.f32.mrb[3].mxu1 }
 0x129   : > { %622 = vst.msk [vmem:[%s1229_s27 + $0x60] sm:$0xff] %vm609_vm2, %v597_v63  ;;  %v598_v3 = vmul.f32 0.25, %v541_v2 }
 0x12a   : > { %625 = vst.msk [vmem:[%s1229_s27 + $0x78] sm:$0xff] %vm609_vm2, %v600_v1 }
 0x12b   : > { %623 = vst.msk [vmem:[%s1229_s27 + $0x68] sm:$0xff] %vm609_vm2, %v598_v3 }
 0x12d   : > { %v814_v6 = vpop.f32.mrb[4].mxu1 }
 0x12e   : > { %v603_v7 = vmul.f32 0.25, %v814_v6  ;;  %v554_v8 = vpop.f32.mrb[5].mxu1 }
 0x12f   : > { %v601_v9 = vmul.f32 0.25, %v554_v8  ;;  %v815_v10 = vpop.f32.mrb[6].mxu1 }
 0x130   : > { %628 = vst.msk [vmem:[%s1229_s27 + $0x90] sm:$0xff] %vm609_vm2, %v603_v7  ;;  %v604_v11 = vmul.f32 0.25, %v815_v10  ;;  %v557_v12 = vpop.f32.mrb[7].mxu1 }
 0x131   : > { %626 = vst.msk [vmem:[%s1229_s27 + $0x80] sm:$0xff] %vm609_vm2, %v601_v9  ;;  %v602_v13 = vmul.f32 0.25, %v557_v12 }
 0x132   : > { %629 = vst.msk [vmem:[%s1229_s27 + $0x98] sm:$0xff] %vm609_vm2, %v604_v11 }
 0x133   : > { %627 = vst.msk [vmem:[%s1229_s27 + $0x88] sm:$0xff] %vm609_vm2, %v602_v13 }
 0x135   : > { %v818_v14 = vpop.f32.mrb[8].mxu1 }
 0x136   : > { %v607_v15 = vmul.f32 0.25, %v818_v14  ;;  %v570_v16 = vpop.f32.mrb[9].mxu1 }
 0x137   : > { %v605_v17 = vmul.f32 0.25, %v570_v16  ;;  %v819_v18 = vpop.f32.mrb[10].mxu1 }
 0x138   : > { %632 = vst.msk [vmem:[%s1229_s27 + $0xb0] sm:$0xff] %vm609_vm2, %v607_v15  ;;  %v608_v20 = vmul.f32 0.25, %v819_v18  ;;  %v573_v21 = vpop.f32.mrb[11].mxu1 }
 0x139   : > { %630 = vst.msk [vmem:[%s1229_s27 + $0xa0] sm:$0xff] %vm609_vm2, %v605_v17  ;;  %v606_v22 = vmul.f32 0.25, %v573_v21 }
 0x13a   : > { %633 = vst.msk [vmem:[%s1229_s27 + $0xb8] sm:$0xff] %vm609_vm2, %v608_v20 }
 0x13b   : > { %631 = vst.msk [vmem:[%s1229_s27 + $0xa8] sm:$0xff] %vm609_vm2, %v606_v22 }
 0x13c   : > { %v798_v23 = vpop.f32.mrb[0].mxu0 }
 0x13d   : > { %v587_v24 = vmul.f32 0.25, %v798_v23  ;;  %v490_v25 = vpop.f32.mrb[1].mxu0 }
 0x13e   : > { %v585_v26 = vmul.f32 0.25, %v490_v25  ;;  %v799_v27 = vpop.f32.mrb[2].mxu0 }
 0x13f   : > { %612 = vst.msk [vmem:[%s1229_s27 + $0x10] sm:$0xff] %vm609_vm2, %v587_v24  ;;  %v588_v28 = vmul.f32 0.25, %v799_v27  ;;  %v493_v29 = vpop.f32.mrb[3].mxu0 }
 0x140   : > { %610 = vst.msk [vmem:[%s1229_s27] sm:$0xff] %vm609_vm2, %v585_v26  ;;  %v586_v30 = vmul.f32 0.25, %v493_v29 }
 0x141   : > { %613 = vst.msk [vmem:[%s1229_s27 + $0x18] sm:$0xff] %vm609_vm2, %v588_v28 }
 0x142   : > { %611 = vst.msk [vmem:[%s1229_s27 + $0x8] sm:$0xff] %vm609_vm2, %v586_v30 }
 0x144   : > { %v802_v31 = vpop.f32.mrb[4].mxu0 }
 0x145   : > { %v591_v32 = vmul.f32 0.25, %v802_v31  ;;  %v506_v33 = vpop.f32.mrb[5].mxu0 }
 0x146   : > { %v589_v4 = vmul.f32 0.25, %v506_v33  ;;  %v803_v5 = vpop.f32.mrb[6].mxu0 }
 0x147   : > { %616 = vst.msk [vmem:[%s1229_s27 + $0x30] sm:$0xff] %vm609_vm2, %v591_v32  ;;  %v592_v34 = vmul.f32 0.25, %v803_v5  ;;  %v509_v35 = vpop.f32.mrb[7].mxu0 }
 0x148   : > { %614 = vst.msk [vmem:[%s1229_s27 + $0x20] sm:$0xff] %vm609_vm2, %v589_v4  ;;  %v590_v36 = vmul.f32 0.25, %v509_v35 }
 0x149   : > { %617 = vst.msk [vmem:[%s1229_s27 + $0x38] sm:$0xff] %vm609_vm2, %v592_v34 }
 0x14a   : > { %615 = vst.msk [vmem:[%s1229_s27 + $0x28] sm:$0xff] %vm609_vm2, %v590_v36 }
 0x14c   : > { %v806_v37 = vpop.f32.mrb[8].mxu0 }
 0x14d   : > { %v595_v38 = vmul.f32 0.25, %v806_v37  ;;  %v522_v39 = vpop.f32.mrb[9].mxu0 }
 0x14e   : > { %v593_v40 = vmul.f32 0.25, %v522_v39  ;;  %v807_v41 = vpop.f32.mrb[10].mxu0 }
 0x14f   : > { %620 = vst.msk [vmem:[%s1229_s27 + $0x50] sm:$0xff] %vm609_vm2, %v595_v38  ;;  %v596_v42 = vmul.f32 0.25, %v807_v41  ;;  %v525_v43 = vpop.f32.mrb[11].mxu0 }
 0x150   : > { %618 = vst.msk [vmem:[%s1229_s27 + $0x40] sm:$0xff] %vm609_vm2, %v593_v40  ;;  %v594_v44 = vmul.f32 0.25, %v525_v43 }
 0x151   : > { %621 = vst.msk [vmem:[%s1229_s27 + $0x58] sm:$0xff] %vm609_vm2, %v596_v42 }
 0x152   : > { %619 = vst.msk [vmem:[%s1229_s27 + $0x48] sm:$0xff] %vm609_vm2, %v594_v44 }
 0x153 PF: > { %p13_p7 = scmp.ge.s32.totalorder %s1039_s17, 4   ;;  %s1301_s12 = smov %s983_s13 }
 0x154   : > { %s1302_s13 = smov %s987_s14  ;;  %s1303_s14 = smov %s1049_s20 }
 0x155   : > { %s1304_s15 = smov %s1039_s17  ;;  %15 = sbr.rel (!%p13_p7) target bundleno = 3 (0x3), region = 75 }
 0x15c   :  { %655 = vsyncpa [#allocation4], 1 }
 0x15d   :  { %657 = vsyncpa [#allocation4 + $0x1], 1 }

</bundles_post_ra>
